<compile_context>
chip_gen: v7x
topology: tpu7x:2x2x1
jax: 0.10.0
libtpu: 0.0.40
codegen_flags: <defaults>
</compile_context>

<pallas_src>
import functools

import jax
import jax.numpy as jnp
import numpy as np
from jax.experimental import pallas as pl
from jax.experimental.pallas import tpu as pltpu

BN_EPS = 1e-5

# The fused single-block path is used whenever its (conservatively double-buffered)
# VMEM footprint stays under this ceiling; the ceiling itself is safe on every
# generation (v5e/v6e physical 128 MiB, v7x physical 64 MiB / 32 MiB default scoped).
_FUSED_VMEM_LIMIT_BYTES = 28 * 1024 * 1024


def _residual_fused_kernel(x_ref, wt_ref, gb_ref, out_ref, *, n_out, concat_in_kernel):
    """Single-block fused fc -> BN(train) -> ReLU (-> concat).

    x_ref:   (B, I)            full input (matmul operand AND the concat pass-through)
    wt_ref:  (I, O)            pre-transposed Linear weight (f32 or bf16)
    gb_ref:  (2, O)            packed [gamma; beta]
    out_ref: (B, O + I) slab if concat_in_kernel else (B, O)
    """
    x = x_ref[...]
    xs = x if x.dtype == wt_ref.dtype else x.astype(wt_ref.dtype)
    # Linear (bias omitted: exactly cancelled by the training-mode BN mean subtraction).
    z = jnp.dot(xs, wt_ref[...], preferred_element_type=jnp.float32)
    # BatchNorm1d training mode: per-feature batch mean / biased variance in f32.
    mean = jnp.mean(z, axis=0, keepdims=True)
    centered = z - mean
    var = jnp.mean(centered * centered, axis=0, keepdims=True)
    gb = gb_ref[...].astype(jnp.float32)
    scale = gb[0:1, :] * jax.lax.rsqrt(var + BN_EPS)   # folded affine
    y = jnp.maximum(centered * scale + gb[1:2, :], 0.0)
    if concat_in_kernel:
        # O is lane-aligned here, so both stores are aligned, lane-dense writes.
        out_ref[:, :n_out] = y.astype(out_ref.dtype)
        out_ref[:, n_out:] = x.astype(out_ref.dtype)
    else:
        out_ref[...] = y.astype(out_ref.dtype)


def _residual_tiled_kernel(x_ref, wt_ref, gb_ref, out_ref, *, tile_n, n_copy, split):
    """One lane tile of the fused (B, O+I) output slab (large-shape fallback).

    Grid order puts the pass-through (concat) tiles in the MIDDLE of the grid so the
    contiguous megacore split gives each TensorCore a similar number of matmul tiles:
       j < split                  -> compute tile j
       split <= j < split+n_copy  -> pass-through tile (j - split)
       j >= split + n_copy        -> compute tile (j - n_copy)
    """
    j = pl.program_id(0)
    is_copy = jnp.logical_and(j >= split, j < split + n_copy)

    @pl.when(jnp.logical_not(is_copy))
    def _compute():
        x = x_ref[...]
        xs = x if x.dtype == wt_ref.dtype else x.astype(wt_ref.dtype)
        z = jnp.dot(xs, wt_ref[...], preferred_element_type=jnp.float32)
        mean = jnp.mean(z, axis=0, keepdims=True)
        centered = z - mean
        var = jnp.mean(centered * centered, axis=0, keepdims=True)
        gb = gb_ref[...].astype(jnp.float32)
        scale = gb[0:1, :] * jax.lax.rsqrt(var + BN_EPS)
        y = centered * scale + gb[1:2, :]
        out_ref[...] = jnp.maximum(y, 0.0).astype(out_ref.dtype)

    @pl.when(is_copy)
    def _copy_x():
        # Fused concat: slice the already-resident x (no second x input stream).
        off = pl.multiple_of((j - split) * tile_n, 128)
        out_ref[...] = x_ref[:, pl.ds(off, tile_n)].astype(out_ref.dtype)


def prepare_residual_params(w, b, gamma, beta, *, param_dtype=jnp.float32):
    """One-time parameter preparation — hoist this OUT of the per-step hot path.

    * W is transposed once to (I, O) so the kernel runs a plain (B,I)@(I,O) MXU matmul
      (no per-call HBM read+write of W for the transpose).
    * The Linear bias is dropped: training-mode BN cancels it exactly.
    * gamma/beta are packed into one (2, O) array -> a single aligned DMA.
    * param_dtype=jnp.bfloat16 stores W^T in bf16 (halves weight HBM traffic; the MXU
      takes it natively with f32 accumulation).  BN parameters stay f32.
    """
    del b  # (z + b) - mean(z + b) == z - mean(z): no-op before training-mode BN.
    wt = jnp.asarray(w, dtype=jnp.float32).T.astype(param_dtype)           # (I, O)
    gb = jnp.stack([jnp.asarray(gamma, jnp.float32),
                    jnp.asarray(beta, jnp.float32)])                        # (2, O)
    return wt, gb


@functools.partial(jax.jit, static_argnames=("force_tiled", "tile_n"))
def residual_apply(x, wt, gb, *, force_tiled=False, tile_n=None):
    """Residual.forward: concat([relu(bn(x @ W^T)), x], axis=1).

    x:  (B, I);  wt: (I, O) pre-transposed weight;  gb: (2, O) packed [gamma; beta].
    Returns (B, O + I).
    """
    B, I = x.shape
    I2, O = wt.shape
    assert I2 == I, (wt.shape, x.shape)
    N = O + I

    cost = pl.CostEstimate(
        flops=2 * B * I * O,
        transcendentals=O,  # one rsqrt per feature
        bytes_accessed=(B * I * x.dtype.itemsize + I * O * wt.dtype.itemsize
                        + 2 * O * gb.dtype.itemsize + B * N * x.dtype.itemsize),
    )

    # --- path selection -----------------------------------------------------------
    fused_bytes = (B * I + I * O + 2 * O + B * N) * 4
    use_fused = (not force_tiled) and (2 * fused_bytes + (1 << 20) <= _FUSED_VMEM_LIMIT_BYTES)

    if not use_fused:
        tn = tile_n
        if tn is None:
            for cand in (512, 256, 128):      # fill the 256-wide MXU on v6e/v7x
                if O % cand == 0 and I % cand == 0:
                    tn = cand
                    break
        if tn is None or O % tn or I % tn:
            # TODO(synk): tiled path for ragged feature dims (pad lane tiles); fall back
            # to the single fused block, which handles any I/O.
            use_fused = True
        else:
            tile_n = tn

    # --- fused single-block path (CTGAN-scale shapes) ------------------------------
    if use_fused:
        concat_in_kernel = (O % 128 == 0)   # x half starts lane-aligned in the slab
        out_cols = N if concat_in_kernel else O
        kernel = functools.partial(_residual_fused_kernel, n_out=O,
                                   concat_in_kernel=concat_in_kernel)
        result = pl.pallas_call(
            kernel,
            out_shape=jax.ShapeDtypeStruct((B, out_cols), x.dtype),
            grid_spec=pltpu.PrefetchScalarGridSpec(
                num_scalar_prefetch=0,
                grid=(1,),
                in_specs=[
                    pl.BlockSpec((B, I), lambda i: (0, 0)),   # x (full block)
                    pl.BlockSpec((I, O), lambda i: (0, 0)),   # W^T (full block)
                    pl.BlockSpec((2, O), lambda i: (0, 0)),   # packed [gamma; beta]
                ],
                out_specs=pl.BlockSpec((B, out_cols), lambda i: (0, 0)),
            ),
            compiler_params=pltpu.CompilerParams(
                dimension_semantics=("arbitrary",),
                vmem_limit_bytes=_FUSED_VMEM_LIMIT_BYTES,
            ),
            cost_estimate=cost,
        )(x, wt, gb)
        if concat_in_kernel:
            return result
        # TODO(synk): in-kernel concat for lane-unaligned O needs an unaligned minor-dim
        # store; one XLA-level concat keeps it correct for ragged CTGAN dims.
        return jnp.concatenate([result, x], axis=1)

    # --- tiled fallback (large, lane-aligned shapes) --------------------------------
    n_compute = O // tile_n
    n_copy = I // tile_n
    split = (n_compute + 1) // 2          # copy tiles sit in the middle of the grid
    grid = (n_compute + n_copy,)

    def _compute_col(j):
        # Copy steps reuse the last compute column (split-1) so no redundant W/param DMA
        # is issued for them on a sequential core.
        return jnp.where(j < split, j, jnp.maximum(j - n_copy, split - 1))

    def _param_map(j):
        return (0, _compute_col(j))

    def _out_map(j):
        is_copy = jnp.logical_and(j >= split, j < split + n_copy)
        return (0, jnp.where(is_copy, n_compute + (j - split), _compute_col(j)))

    kernel = functools.partial(_residual_tiled_kernel, tile_n=tile_n,
                               n_copy=n_copy, split=split)

    # Resident x + double-buffered W^T / param / out tiles (+ margin).  Capped at 64 MiB
    # (v7x physical VMEM).  TODO(synk): tile the batch with a two-pass BN once
    # B*I*4 bytes approaches tens of MiB (matters on v7x's 64 MiB VMEM).
    tile_bytes = (I * tile_n * wt.dtype.itemsize + 2 * tile_n * gb.dtype.itemsize
                  + B * tile_n * x.dtype.itemsize)
    vmem_limit = min(max(B * I * x.dtype.itemsize + 2 * tile_bytes + (4 << 20),
                         32 << 20), 64 << 20)

    return pl.pallas_call(
        kernel,
        out_shape=jax.ShapeDtypeStruct((B, N), x.dtype),
        grid_spec=pltpu.PrefetchScalarGridSpec(
            num_scalar_prefetch=0,
            grid=grid,
            in_specs=[
                pl.BlockSpec((B, I), lambda j: (0, 0)),     # x, fully resident
                pl.BlockSpec((I, tile_n), _param_map),      # W^T lane tile
                pl.BlockSpec((2, tile_n), _param_map),      # packed [gamma; beta] tile
            ],
            out_specs=pl.BlockSpec((B, tile_n), _out_map),  # tile of the (B, O+I) slab
        ),
        compiler_params=pltpu.CompilerParams(
            # Every output tile is written exactly once; copy tiles in the middle keep
            # the contiguous megacore split balanced in matmul work.
            dimension_semantics=("parallel",),
            vmem_limit_bytes=int(vmem_limit),
        ),
        cost_estimate=cost,
    )(x, wt, gb)


def residual_forward(x, w, b, gamma, beta, **kwargs):
    """Convenience wrapper (API parity with the PyTorch module).

    In a training loop, call `prepare_residual_params` once and `residual_apply` per
    step so the weight transpose is not re-materialized every forward call.
    """
    wt, gb = prepare_residual_params(w, b, gamma, beta)
    return residual_apply(x, wt, gb, **kwargs)


def _reference(x, w, b, gamma, beta):
    z = x @ w.T + b
    mean = jnp.mean(z, axis=0, keepdims=True)
    var = jnp.mean((z - mean) ** 2, axis=0, keepdims=True)
    y = (z - mean) / jnp.sqrt(var + BN_EPS) * gamma + beta
    return jnp.concatenate([jnp.maximum(y, 0.0), x], axis=1)


if __name__ == "__main__":
    def run_case(B, I, O, *, force_tiled=False, tile_n=None,
                 param_dtype=jnp.float32, rtol=1e-5, atol=2e-5):
        key = jax.random.PRNGKey(0)
        kx, kw, kb, kg, kbe = jax.random.split(key, 5)
        x = jax.random.normal(kx, (B, I), dtype=jnp.float32)
        bound = 1.0 / np.sqrt(I)
        w = jax.random.uniform(kw, (O, I), minval=-bound, maxval=bound, dtype=jnp.float32)
        b = jax.random.uniform(kb, (O,), minval=-bound, maxval=bound, dtype=jnp.float32)
        gamma = jax.random.uniform(kg, (O,), minval=0.5, maxval=1.5, dtype=jnp.float32)
        beta = jax.random.uniform(kbe, (O,), minval=-0.5, maxval=0.5, dtype=jnp.float32)

        wt, gb = prepare_residual_params(w, b, gamma, beta, param_dtype=param_dtype)
        out = jax.block_until_ready(
            residual_apply(x, wt, gb, force_tiled=force_tiled, tile_n=tile_n))
        ref = _reference(x, w, b, gamma, beta)
        assert out.shape == (B, O + I), out.shape
        np.testing.assert_allclose(np.asarray(out), np.asarray(ref), rtol=rtol, atol=atol)

    # 1) CTGAN-scale shape -> collapsed single-block fused path (no grid overhead).
    run_case(16, 128, 256)
    # 2) Larger lane-aligned shape forced down the tiled path (wide tiles, interleaved
    #    compute/copy grid order, resident-x slicing for the concat).
    run_case(64, 256, 512, force_tiled=True, tile_n=256, rtol=1e-5, atol=5e-5)
    # 3) Ragged feature dims (typical CTGAN data_dim + cond_dim): fused compute kernel,
    #    XLA-level concat fallback.
    run_case(16, 120, 200, rtol=1e-5, atol=5e-5)
    # 4) bf16 weights (halved weight HBM traffic), quantization-limited tolerance.
    run_case(16, 128, 256, param_dtype=jnp.bfloat16, rtol=1e-1, atol=1e-1)

    print("KERNEL_OK")
</pallas_src>

<mosaic_0001>
module attributes {stable_mosaic.version = 11 : i64} {
  func.func @_residual_fused_kernel(%arg0: i32, %arg1: memref<16x128xf32, #tpu.memory_space<vmem>>, %arg2: memref<128x256xf32, #tpu.memory_space<vmem>>, %arg3: memref<2x256xf32, #tpu.memory_space<vmem>>, %arg4: memref<16x384xf32, #tpu.memory_space<vmem>>) attributes {dimension_semantics = [#tpu.dimension_semantics<arbitrary>], iteration_bounds = array<i64: 1>, scalar_prefetch = 0 : i64, scratch_operands = 0 : i64, tpu.core_type = #tpu.core_type<tc>, window_params = [{pipeline_mode = #tpu.pipeline_mode<synchronous>, transform_indices = @transform_0, window_bounds = array<i64: 16, 128>}, {pipeline_mode = #tpu.pipeline_mode<synchronous>, transform_indices = @transform_1, window_bounds = array<i64: 128, 256>}, {pipeline_mode = #tpu.pipeline_mode<synchronous>, transform_indices = @transform_2, window_bounds = array<i64: 2, 256>}, {pipeline_mode = #tpu.pipeline_mode<synchronous>, transform_indices = @transform_3, window_bounds = array<i64: 16, 384>}]} {
    %c0 = arith.constant 0 : index
    %c0_0 = arith.constant 0 : index
    %0 = vector.load %arg1[%c0, %c0_0] : memref<16x128xf32, #tpu.memory_space<vmem>>, vector<16x128xf32>
    %c0_1 = arith.constant 0 : index
    %c0_2 = arith.constant 0 : index
    %1 = vector.load %arg2[%c0_1, %c0_2] : memref<128x256xf32, #tpu.memory_space<vmem>>, vector<128x256xf32>
    %cst = arith.constant dense<0.000000e+00> : vector<16x256xf32>
    %2 = tpu.matmul %0, %1, %cst {dimension_numbers = #tpu.dot_dimension_numbers<[1], [0], [0], [1], [0, 0, 1, 1], [], []>} : vector<16x128xf32>, vector<128x256xf32>, vector<16x256xf32> -> vector<16x256xf32>
    %cst_3 = arith.constant dense<0.000000e+00> : vector<256xf32>
    %3 = vector.multi_reduction <add>, %2, %cst_3 [0] : vector<16x256xf32> to vector<256xf32>
    %4 = vector.shape_cast %3 : vector<256xf32> to vector<1x256xf32>
    %cst_4 = arith.constant 1.600000e+01 : f32
    %5 = vector.broadcast %cst_4 : f32 to vector<1x256xf32>
    %6 = arith.divf %4, %5 : vector<1x256xf32>
    %7 = vector.broadcast %6 : vector<1x256xf32> to vector<16x256xf32>
    %8 = arith.subf %2, %7 : vector<16x256xf32>
    %9 = arith.mulf %8, %8 : vector<16x256xf32>
    %cst_5 = arith.constant dense<0.000000e+00> : vector<256xf32>
    %10 = vector.multi_reduction <add>, %9, %cst_5 [0] : vector<16x256xf32> to vector<256xf32>
    %11 = vector.shape_cast %10 : vector<256xf32> to vector<1x256xf32>
    %cst_6 = arith.constant 1.600000e+01 : f32
    %12 = vector.broadcast %cst_6 : f32 to vector<1x256xf32>
    %13 = arith.divf %11, %12 : vector<1x256xf32>
    %c0_7 = arith.constant 0 : index
    %c0_8 = arith.constant 0 : index
    %14 = vector.load %arg3[%c0_7, %c0_8] : memref<2x256xf32, #tpu.memory_space<vmem>>, vector<2x256xf32>
    %15 = vector.extract_strided_slice %14 {offsets = [0, 0], sizes = [1, 256], strides = [1, 1]} : vector<2x256xf32> to vector<1x256xf32>
    %cst_9 = arith.constant 9.99999974E-6 : f32
    %16 = vector.broadcast %cst_9 : f32 to vector<1x256xf32>
    %17 = arith.addf %13, %16 : vector<1x256xf32>
    %18 = math.rsqrt %17 : vector<1x256xf32>
    %19 = arith.mulf %15, %18 : vector<1x256xf32>
    %20 = vector.broadcast %19 : vector<1x256xf32> to vector<16x256xf32>
    %21 = arith.mulf %8, %20 : vector<16x256xf32>
    %22 = vector.extract_strided_slice %14 {offsets = [1, 0], sizes = [1, 256], strides = [1, 1]} : vector<2x256xf32> to vector<1x256xf32>
    %23 = vector.broadcast %22 : vector<1x256xf32> to vector<16x256xf32>
    %24 = arith.addf %21, %23 : vector<16x256xf32>
    %cst_10 = arith.constant 0.000000e+00 : f32
    %25 = vector.broadcast %cst_10 : f32 to vector<16x256xf32>
    %26 = arith.maximumf %24, %25 : vector<16x256xf32>
    %c0_11 = arith.constant 0 : index
    %c0_12 = arith.constant 0 : index
    %27 = vector.load %arg4[%c0_11, %c0_12] : memref<16x384xf32, #tpu.memory_space<vmem>>, vector<16x256xf32>
    tpu.vector_store %arg4[%c0_11, %c0_12], %26 {strides = array<i32>} : memref<16x384xf32, #tpu.memory_space<vmem>>, vector<16x256xf32>,
    %c0_13 = arith.constant 0 : index
    %c256 = arith.constant 256 : index
    %28 = vector.load %arg4[%c0_13, %c256] : memref<16x384xf32, #tpu.memory_space<vmem>>, vector<16x128xf32>
    tpu.vector_store %arg4[%c0_13, %c256], %0 {strides = array<i32>} : memref<16x384xf32, #tpu.memory_space<vmem>>, vector<16x128xf32>,
    return
  }
  func.func @transform_0(%arg0: i32) -> (i32, i32) {
    %c0_i32 = arith.constant 0 : i32
    %c0_i32_0 = arith.constant 0 : i32
    %c0_i32_1 = arith.constant 0 : i32
    return %c0_i32, %c0_i32_0 : i32, i32
  }
  func.func @transform_1(%arg0: i32) -> (i32, i32) {
    %c0_i32 = arith.constant 0 : i32
    %c0_i32_0 = arith.constant 0 : i32
    %c0_i32_1 = arith.constant 0 : i32
    return %c0_i32, %c0_i32_0 : i32, i32
  }
  func.func @transform_2(%arg0: i32) -> (i32, i32) {
    %c0_i32 = arith.constant 0 : i32
    %c0_i32_0 = arith.constant 0 : i32
    %c0_i32_1 = arith.constant 0 : i32
    return %c0_i32, %c0_i32_0 : i32, i32
  }
  func.func @transform_3(%arg0: i32) -> (i32, i32) {
    %c0_i32 = arith.constant 0 : i32
    %c0_i32_0 = arith.constant 0 : i32
    %c0_i32_1 = arith.constant 0 : i32
    return %c0_i32, %c0_i32_0 : i32, i32
  }
}

</mosaic_0001>

<bundles_post_ra>
// kernel: residual_apply.1
= control target key start
LH: loop header
LB: loop body
LE: loop exit
PB: predicated region body
PF: predicated region fallthrough
CT: control target
= control target key end

     0   :  { %8 = vsyncpa [#allocation3], 0  ;;  %s491_s0 = inlined_call_operand.hbm [shape: f32[16,128], index: 0, kind: input, shape index: {}]   ;;  %s492_s1 = inlined_call_operand.hbm [shape: f32[128,256], index: 1, kind: input, shape index: {}]   ;;  %s493_s2 = inlined_call_operand.vmem [shape: f32[2,256], index: 2, kind: input, shape index: {}]   ;;  %s494_s3 = inlined_call_operand.hbm [shape: f32[16,384], index: 3, kind: output, shape index: {}]  }
   0x1   :  { %9 = vsyncpa [#allocation6], 0 }
   0x2   :  { %10 = vsyncpa [#allocation4], 0  ;;  %s421_s12 = smov [#allocation2]   ;;  %s349_s16 = scalar_lea.hbm %s491_s0, 256 }
   0x3   :  { %s16_s13 = sshll.u32 %s421_s12, 4  ;;  %p350_p0 = scmp.ne.s32.totalorder %s491_s0, %s349_s16  ;;  %s17_s13 = int_to_ptr.vmem [resolvable:$true] %s16_s13 }
   0x4   :  { %p353_p1 = scmp.lt.u32.totalorder %s349_s16, %s491_s0 }
   0x6   :  { %p355_p2 = pnand %p353_p1, %p350_p0 }
   0x8   :  { %358 = shalt.err (!%p355_p2)
}
   0x9   :  { %s359_s21 = scalar_lea.vmem %s17_s13, 256  ;;  %p364_p4 = scmp.lt.s32.totalorder %s17_s13, %s17_s13 }
   0xa   :  { %p360_p3 = scmp.ne.s32.totalorder %s17_s13, %s359_s21  ;;  %p365_p5 = scmp.lt.s32.totalorder %s359_s21, %s359_s21 }
   0xc   :  { %p366_p6 = por %p365_p5, %p364_p4 }
   0xe   :  { %p367_p7 = pnand %p366_p6, %p360_p3 }
  0x10   :  { %370 = shalt.err (!%p367_p7)
}
  0x11   :  { %s422_s22 = smov 128   ;;  %s423_s23 = smov 8  }
  0x12   :  { %22 = dma.hbm_to_vmem [thread:$0]  %s491_s0, 256, %s17_s13, [#allocation3], %s422_s22, %s422_s22, %s423_s23  }
  0x13   :  { %s424_s26 = smov [#allocation5]   ;;  %s371_s30 = scalar_lea.hbm %s492_s1, 4096 }
  0x14   :  { %s28_s27 = sshll.u32 %s424_s26, 4  ;;  %p372_p8 = scmp.ne.s32.totalorder %s492_s1, %s371_s30  ;;  %s29_s27 = int_to_ptr.vmem [resolvable:$true] %s28_s27 }
  0x15   :  { %p375_p9 = scmp.lt.u32.totalorder %s371_s30, %s492_s1 }
  0x17   :  { %p377_p10 = pnand %p375_p9, %p372_p8 }
  0x19   :  { %380 = shalt.err (!%p377_p10)
}
  0x1a   :  { %s381_s8 = scalar_lea.vmem %s29_s27, 4096  ;;  %p386_p12 = scmp.lt.s32.totalorder %s29_s27, %s29_s27 }
  0x1b   :  { %p382_p11 = scmp.ne.s32.totalorder %s29_s27, %s381_s8  ;;  %p387_p13 = scmp.lt.s32.totalorder %s381_s8, %s381_s8 }
  0x1d   :  { %p388_p0 = por %p387_p13, %p386_p12 }
  0x1f   :  { %p389_p1 = pnand %p388_p0, %p382_p11 }
  0x21   :  { %392 = shalt.err (!%p389_p1)
}
  0x22   :  { %s425_s0 = smov 256   ;;  %s426_s9 = smov 16  }
  0x23   :  { %34 = dma.hbm_to_vmem [thread:$0]  %s492_s1, 4096, %s29_s27, [#allocation6], %s425_s0, %s425_s0, %s426_s9  }
  0x24   :  { %415 = dma.done.wait [#allocation3], 256  }
  0x25   :  { %416 = vsyncadd [#allocation3], 4294967040 }
  0x26   :  { %417 = dma.done.wait [#allocation6], 4096  }
  0x27   :  { %418 = vsyncadd [#allocation6], 4294963200  ;;  %v427_v0 = vmov 0.0   ;;  %v46_v1 = vld [vmem:[#allocation5 + $0x8] sm:$0xff]  ;;  %v48_v2 = vld [vmem:[#allocation5 + $0x18] sm:$0xff]  ;;  %s429_s13 = smov [#allocation7]  }
  0x28   :  { %141 = vmatprep.mubr.f32.mxu0 %v427_v0  ;;  %147 = vmatprep.mubr.f32.mxu1 %v427_v0  ;;  %v45_v3 = vld [vmem:[#allocation5] sm:$0xff]  ;;  %v286_v4 = vpack.c.bf16 %v48_v2, %v46_v1  ;;  %v47_v5 = vld [vmem:[#allocation5 + $0x10] sm:$0xff]  ;;  %v50_v6 = vld [vmem:[#allocation5 + $0x28] sm:$0xff]  ;;  %s273_s14 = sshll.u32 %s429_s13, 4  ;;  %s274_s14 = int_to_ptr.vmem [resolvable:$true] %s273_s14 }
  0x29   :  { %v52_v7 = vld [vmem:[#allocation5 + $0x38] sm:$0xff]  ;;  %v288_v8 = vpack.c.bf16 %v47_v5, %v45_v3  ;;  %v49_v10 = vld [vmem:[#allocation5 + $0x20] sm:$0xff]  ;;  %v51_v11 = vld [vmem:[#allocation5 + $0x30] sm:$0xff]  ;;  %p398_p3 = scmp.lt.s32.totalorder %s274_s14, %s274_s14 }
  0x2a   :  { %v290_v9 = vpack.c.bf16 %v52_v7, %v50_v6  ;;  %v54_v12 = vld [vmem:[#allocation5 + $0x48] sm:$0xff]  ;;  %287 = vmatprep.subr.bf16.mxu0 %v286_v4  ;;  %318 = vmatprep.subr.bf16.mxu1 %v286_v4  ;;  %v56_v13 = vld [vmem:[#allocation5 + $0x58] sm:$0xff]  ;;  %v292_v14 = vpack.c.bf16 %v51_v11, %v49_v10  ;;  %v53_v16 = vld [vmem:[#allocation5 + $0x40] sm:$0xff] }
  0x2b   :  { %289 = vmatpush1.bf16.msra.mxu0 %v288_v8  ;;  %326 = vmatpush1.bf16.msra.mxu1 %v288_v8  ;;  %v294_v15 = vpack.c.bf16 %v56_v13, %v54_v12  ;;  %v55_v17 = vld [vmem:[#allocation5 + $0x50] sm:$0xff]  ;;  %v58_v18 = vld [vmem:[#allocation5 + $0x68] sm:$0xff]  ;;  %v60_v19 = vld [vmem:[#allocation5 + $0x78] sm:$0xff] }
  0x2c   :  { %291 = vmatprep.subr.bf16.mxu0 %v290_v9  ;;  %319 = vmatprep.subr.bf16.mxu1 %v290_v9  ;;  %v296_v20 = vpack.c.bf16 %v55_v17, %v53_v16  ;;  %v298_v21 = vpack.c.bf16 %v60_v19, %v58_v18  ;;  %v57_v22 = vld [vmem:[#allocation5 + $0x60] sm:$0xff]  ;;  %v59_v23 = vld [vmem:[#allocation5 + $0x70] sm:$0xff]  ;;  %v62_v24 = vld [vmem:[#allocation5 + $0x88] sm:$0xff] }
  0x2d   :  { %v64_v25 = vld [vmem:[#allocation5 + $0x98] sm:$0xff]  ;;  %v43_v26 = vld [vmem:[#allocation2] sm:$0xff]  ;;  %v300_v28 = vpack.c.bf16 %v59_v23, %v57_v22  ;;  %v61_v30 = vld [vmem:[#allocation5 + $0x80] sm:$0xff] }
  0x2e   :  { %266 = vst [vmem:[#allocation7 + $0x10] sm:$0xff] %v43_v26  ;;  %v44_v27 = vld [vmem:[#allocation2 + $0x8] sm:$0xff]  ;;  %v302_v29 = vpack.c.bf16 %v64_v25, %v62_v24  ;;  %v63_v31 = vld [vmem:[#allocation5 + $0x90] sm:$0xff]  ;;  %v66_v32 = vld [vmem:[#allocation5 + $0xa8] sm:$0xff] }
  0x2f   :  { %293 = vmatpush1.bf16.msra.mxu0 %v292_v14  ;;  %327 = vmatpush1.bf16.msra.mxu1 %v292_v14  ;;  %267 = vst [vmem:[#allocation7 + $0x28] sm:$0xff] %v44_v27  ;;  %v68_v33 = vld [vmem:[#allocation5 + $0xb8] sm:$0xff]  ;;  %v304_v34 = vpack.c.bf16 %v63_v31, %v61_v30  ;;  %v65_v36 = vld [vmem:[#allocation5 + $0xa0] sm:$0xff]  ;;  %v67_v37 = vld [vmem:[#allocation5 + $0xb0] sm:$0xff] }
  0x30   :  { %295 = vmatprep.subr.bf16.mxu0 %v294_v15  ;;  %320 = vmatprep.subr.bf16.mxu1 %v294_v15  ;;  %v306_v35 = vpack.c.bf16 %v68_v33, %v66_v32  ;;  %v70_v38 = vld [vmem:[#allocation5 + $0xc8] sm:$0xff]  ;;  %v72_v39 = vld [vmem:[#allocation5 + $0xd8] sm:$0xff]  ;;  %v308_v40 = vpack.c.bf16 %v67_v37, %v65_v36  ;;  %v69_v42 = vld [vmem:[#allocation5 + $0xc0] sm:$0xff]  ;;  %v428_v33 = vmov 1983009808  }
  0x31   :  { %v310_v41 = vpack.c.bf16 %v72_v39, %v70_v38  ;;  %v71_v43 = vld [vmem:[#allocation5 + $0xd0] sm:$0xff]  ;;  %v74_v44 = vld [vmem:[#allocation5 + $0xe8] sm:$0xff]  ;;  %v76_v45 = vld [vmem:[#allocation5 + $0xf8] sm:$0xff] }
  0x32   :  { %v312_v46 = vpack.c.bf16 %v71_v43, %v69_v42  ;;  %v314_v47 = vpack.c.bf16 %v76_v45, %v74_v44  ;;  %v73_v48 = vld [vmem:[#allocation5 + $0xe0] sm:$0xff]  ;;  %v75_v49 = vld [vmem:[#allocation5 + $0xf0] sm:$0xff] }
  0x33   :  { %297 = vmatpush1.bf16.msra.mxu0 %v296_v20  ;;  %328 = vmatpush1.bf16.msra.mxu1 %v296_v20  ;;  %v316_v50 = vpack.c.bf16 %v75_v49, %v73_v48  ;;  %v195_v44 = vld [vmem:[%s493_s2] sm:$0xf]  ;;  %s393_s2 = scalar_lea.vmem %s274_s14, 768 }
  0x34   :  { %299 = vmatprep.subr.bf16.mxu0 %v298_v21  ;;  %321 = vmatprep.subr.bf16.mxu1 %v298_v21  ;;  %p394_p2 = scmp.ne.s32.totalorder %s274_s14, %s393_s2  ;;  %p399_p4 = scmp.lt.s32.totalorder %s393_s2, %s393_s2 }
  0x36   :  { %p400_p5 = por %p399_p4, %p398_p3 }
  0x37   :  { %301 = vmatpush1.bf16.msra.mxu0 %v300_v28  ;;  %329 = vmatpush1.bf16.msra.mxu1 %v300_v28 }
  0x38   :  { %303 = vmatprep.subr.bf16.mxu0 %v302_v29  ;;  %322 = vmatprep.subr.bf16.mxu1 %v302_v29  ;;  %p401_p6 = pnand %p400_p5, %p394_p2 }
  0x3b   :  { %305 = vmatpush1.bf16.msra.mxu0 %v304_v34  ;;  %330 = vmatpush1.bf16.msra.mxu1 %v304_v34  ;;  %v204_v34 = vunpack.c.l.s4 %v428_v33 }
  0x3c   :  { %307 = vmatprep.subr.bf16.mxu0 %v306_v35  ;;  %323 = vmatprep.subr.bf16.mxu1 %v306_v35  ;;  %v206_v35 = vlaneseq }
  0x3d   :  { %v205_v36 = vunpack.c.0.s8 %v204_v34 }
  0x3e   :  { %v207_v37 = vshrl.u32 %v206_v35, 7 }
  0x3f   :  { %309 = vmatpush1.bf16.msra.mxu0 %v308_v40  ;;  %331 = vmatpush1.bf16.msra.mxu1 %v308_v40 }
  0x40   :  { %311 = vmatprep.subr.bf16.mxu0 %v310_v41  ;;  %324 = vmatprep.subr.bf16.mxu1 %v310_v41  ;;  %v208_v39 = vsub.s32 %v205_v36, %v207_v37  ;;  %v238_v42 = vsub.s32 1, %v207_v37  ;;  %v242_v43 = vsub.s32 3, %v207_v37 }
  0x42   :  { %v239_v49 = vrot.slane %v195_v44, %v238_v42 }
  0x43   :  { %313 = vmatpush1.bf16.msra.mxu0 %v312_v46  ;;  %332 = vmatpush1.bf16.msra.mxu1 %v312_v46  ;;  %v215_v46 = vsub.s32 0, %v207_v37 }
  0x44   :  { %315 = vmatprep.subr.bf16.mxu0 %v314_v47  ;;  %325 = vmatprep.subr.bf16.mxu1 %v314_v47  ;;  %v219_v47 = vsub.s32 2, %v207_v37 }
  0x47   :  { %317 = vmatpush1.bf16.msra.mxu0 %v316_v50  ;;  %333 = vmatpush1.bf16.msra.mxu1 %v316_v50  ;;  %v243_v50 = vrot.slane %v195_v44, %v242_v43 }
  0x4a   :  { %142 = vmatmul.mubr.f32.vlgmr.msra.gmra.mrb[0].mxu0 %v43_v26  ;;  %148 = vmatmul.mubr.f32.vlgmr.msra.gmra.mrb[0].mxu1 %v44_v27 }
 0x11d   :  { %v143_v51 = vpop.f32.mrb[0].mxu0  ;;  %v149_v52 = vpop.f32.mrb[0].mxu1 }
 0x11e   :  { %v154_v53 = vadd.f32 %v149_v52, %v143_v51  ;;  %v145_v54 = vpop.f32.mrb[1].mxu0  ;;  %v151_v55 = vpop.f32.mrb[1].mxu1 }
 0x11f   :  { %v161_v56 = vadd.f32 %v151_v55, %v145_v54 }
 0x120   :  { %v155_v57 = vrot.slane %v154_v53, 4 }
 0x121   :  { %v162_v58 = vrot.slane %v161_v56, 4 }
 0x122   :  { %v156_v59 = vadd.f32 %v155_v57, %v154_v53 }
 0x123   :  { %v163_v60 = vadd.f32 %v162_v58, %v161_v56  ;;  %v253_v56 = vrot.slane %v243_v50, %v238_v42 }
 0x124   :  { %v157_v61 = vrot.slane %v156_v59, 2 }
 0x125   :  { %v164_v62 = vrot.slane %v163_v60, 2 }
 0x126   :  { %v158_v63 = vadd.f32 %v157_v61, %v156_v59 }
 0x127   :  { %v165_v0 = vadd.f32 %v164_v62, %v163_v60 }
 0x128   :  { %v159_v1 = vrot.slane %v158_v63, 1 }
 0x129   :  { %v166_v2 = vrot.slane %v165_v0, 1 }
 0x12a   :  { %v160_v3 = vadd.f32 %v159_v1, %v158_v63 }
 0x12b   :  { %v167_v4 = vadd.f32 %v166_v2, %v165_v0 }
 0x12c   :  { %v169_v5 = vmul.f32 0.0625, %v160_v3 }
 0x12d   :  { %v170_v6 = vmul.f32 0.0625, %v167_v4 }
 0x12e   :  { %v171_v7 = vsub.f32 %v143_v51, %v169_v5  ;;  %v173_v8 = vsub.f32 %v149_v52, %v169_v5 }
 0x12f   :  { %v172_v9 = vsub.f32 %v145_v54, %v170_v6  ;;  %v174_v10 = vsub.f32 %v151_v55, %v170_v6  ;;  %v249_v55 = vrot.slane %v239_v49, %v238_v42 }
 0x130   :  { %v175_v11 = vmul.f32 %v171_v7, %v171_v7  ;;  %v177_v12 = vmul.f32 %v173_v8, %v173_v8 }
 0x131   :  { %v176_v13 = vmul.f32 %v172_v9, %v172_v9  ;;  %v178_v14 = vmul.f32 %v174_v10, %v174_v10 }
 0x132   :  { %v179_v15 = vadd.f32 %v177_v12, %v175_v11 }
 0x133   :  { %v186_v16 = vadd.f32 %v178_v14, %v176_v13 }
 0x134   :  { %v180_v17 = vrot.slane %v179_v15, 4 }
 0x135   :  { %v187_v18 = vrot.slane %v186_v16, 4 }
 0x136   :  { %v181_v19 = vadd.f32 %v180_v17, %v179_v15 }
 0x137   :  { %v188_v20 = vadd.f32 %v187_v18, %v186_v16 }
 0x138   :  { %v182_v21 = vrot.slane %v181_v19, 2 }
 0x139   :  { %v189_v22 = vrot.slane %v188_v20, 2 }
 0x13a   :  { %v183_v23 = vadd.f32 %v182_v21, %v181_v19 }
 0x13b   :  { %v190_v24 = vadd.f32 %v189_v22, %v188_v20 }
 0x13c   :  { %v184_v25 = vrot.slane %v183_v23, 1 }
 0x13d   :  { %v191_v26 = vrot.slane %v190_v24, 1 }
 0x13e   :  { %v185_v27 = vadd.f32 %v184_v25, %v183_v23 }
 0x13f   :  { %v192_v28 = vadd.f32 %v191_v26, %v190_v24 }
 0x140   :  { %v193_v29 = vmul.f32 0.0625, %v185_v27 }
 0x141   :  { %v194_v30 = vmul.f32 0.0625, %v192_v28 }
 0x142   :  { %v196_v31 = vadd.f32 1e-05, %v193_v29 }
 0x143   :  { %v197_v32 = vadd.f32 1e-05, %v194_v30 }
 0x144   :  { %345 = vrsqrt.f32 %v196_v31 }
 0x145   :  { %347 = vrsqrt.f32 %v197_v32 }
 0x14e   :  { %v346_v38 = vpop.eup %345 }
 0x14f   :  { %v348_v40 = vpop.eup %347 }
 0x150   :  { %v202_v41 = vcombine.low %v346_v38, %v348_v40 }
 0x152   :  { %v209_v45 = vrot.slane %v202_v41, %v208_v39 }
 0x154   :  { %v211_v48 = vmul.f32 %v209_v45, %v195_v44 }
 0x156   :  { %v216_v51 = vrot.slane %v211_v48, %v215_v46  ;;  %v220_v52 = vrot.slane %v211_v48, %v219_v47 }
 0x158   :  { %v226_v53 = vrot.slane %v216_v51, %v215_v46  ;;  %v230_v54 = vrot.slane %v220_v52, %v215_v46 }
 0x15a   :  { %v231_v57 = vmul.f32 %v226_v53, %v171_v7  ;;  %v232_v58 = vmul.f32 %v230_v54, %v172_v9  ;;  %v233_v59 = vmul.f32 %v226_v53, %v173_v8  ;;  %v234_v60 = vmul.f32 %v230_v54, %v174_v10 }
 0x15c   :  { %v254_v61 = vadd.f32 %v249_v55, %v231_v57  ;;  %v255_v62 = vadd.f32 %v253_v56, %v232_v58  ;;  %v256_v63 = vadd.f32 %v249_v55, %v233_v59  ;;  %v257_v0 = vadd.f32 %v253_v56, %v234_v60 }
 0x15e   :  { %v258_v1 = vmax.f32 %v254_v61, 0.0  ;;  %v259_v2 = vmax.f32 %v255_v62, 0.0  ;;  %v260_v3 = vmax.f32 %v256_v63, 0.0  ;;  %v261_v4 = vmax.f32 %v257_v0, 0.0 }
 0x160   :  { %262 = vst [vmem:[#allocation7] sm:$0xff] %v258_v1  ;;  %263 = vst [vmem:[#allocation7 + $0x8] sm:$0xff] %v259_v2 }
 0x161   :  { %264 = vst [vmem:[#allocation7 + $0x18] sm:$0xff] %v260_v3  ;;  %265 = vst [vmem:[#allocation7 + $0x20] sm:$0xff] %v261_v4 }
 0x162   :  { %404 = shalt.err (!%p401_p6)
}
 0x163   :  { %s405_s17 = scalar_lea.hbm %s494_s3, 768 }
 0x164   :  { %p406_p7 = scmp.ne.s32.totalorder %s494_s3, %s405_s17  ;;  %p409_p8 = scmp.lt.u32.totalorder %s405_s17, %s494_s3 }
 0x166   :  { %p411_p9 = pnand %p409_p8, %p406_p7 }
 0x168   :  { %414 = shalt.err (!%p411_p9)
}
 0x169   :  { %s430_s22 = smov 384   ;;  %s431_s23 = smov 24  }
 0x16a   :  { %279 = dma.vmem_to_hbm [thread:$0]  %s274_s14, 768, %s494_s3, [#allocation4], %s430_s22, %s430_s22, %s431_s23  }
 0x16b   :  { %419 = dma.done.wait [#allocation4], 768  }
 0x16c   :  { %420 = vsyncadd [#allocation4], 4294966528 }
 0x16d   :  { %283 = vsyncpa [#allocation3], 1 }
 0x16e   :  { %284 = vsyncpa [#allocation6], 1 }
 0x16f   :  { %285 = vsyncpa [#allocation4], 1 }

</bundles_post_ra>
